<compile_context>
chip_gen: v5e
topology: v5e:2x2
jax: 0.10.0
libtpu: 0.0.40
codegen_flags: <defaults>
</compile_context>

<pallas_src>
import functools

import jax
import jax.numpy as jnp
from jax.experimental import pallas as pl
from jax.experimental.pallas import tpu as pltpu

_LANE = 128
_SUBLANE = 8


def _round_up(x, m):
    return (x + m - 1) // m * m


def _mlp_kernel(num_layers, relu_flags, matmul_dtype,
                x_ref, w_ref, b_ref, o_ref):
    """Fused MLP for one batch tile (all layers unrolled).

    x_ref: (TILE_B, D_pad)      packed activation rows
    w_ref: (L, D_pad, D_pad)    packed (block-diagonal) weights, VMEM resident
    b_ref: (L, 1, D_pad)        packed biases
    o_ref: (TILE_B, D_pad)      packed output rows
    """
    h = x_ref[...].astype(jnp.float32)
    for layer in range(num_layers):                  # static unroll
        w = w_ref[layer]                             # (D_pad, D_pad)
        b = b_ref[layer]                             # (1, D_pad)
        if matmul_dtype is not None:
            h_in = h.astype(matmul_dtype)
            w_in = w.astype(matmul_dtype)
        else:
            h_in, w_in = h, w
        h = jnp.dot(h_in, w_in, preferred_element_type=jnp.float32)
        h = h + b                                    # f32 VPU work (free slack)
        if relu_flags[layer]:
            h = jnp.maximum(h, 0.0)
    o_ref[...] = h.astype(o_ref.dtype)


def prepare_mlp_params(weights, biases, *, lane=_LANE):
    """One-time packing of the Linear parameters for the fused kernel.

    If every layer maps D -> D with D a divisor of `lane`, pack = lane // D
    logical rows are packed per 128-lane row: each weight becomes the
    pack-way block-diagonal kron(I_pack, W) and each bias is tiled `pack`
    times across the lanes (exact arithmetic: off-diagonal blocks are zero).
    Otherwise fall back to zero-padding each feature dim to a lane multiple.
    """
    num_layers = len(weights)
    weights = [jnp.asarray(w, jnp.float32) for w in weights]
    biases = [jnp.asarray(b, jnp.float32).reshape(1, -1) for b in biases]
    dims_in = [w.shape[0] for w in weights]
    dims_out = [w.shape[1] for w in weights]
    d = dims_in[0]
    uniform = all(di == d for di in dims_in) and all(do == d for do in dims_out)

    if uniform and d <= lane and lane % d == 0:
        pack = lane // d
        d_pad = lane
        eye = jnp.eye(pack, dtype=jnp.float32)
        w_packed = jnp.stack([jnp.kron(eye, w) for w in weights])
        b_packed = jnp.stack([jnp.tile(b, (1, pack)) for b in biases])
    else:
        pack = 1
        d_pad = _round_up(max(max(dims_in), max(dims_out)), lane)
        w_packed = jnp.stack([
            jnp.pad(w, ((0, d_pad - w.shape[0]), (0, d_pad - w.shape[1])))
            for w in weights])
        b_packed = jnp.stack([
            jnp.pad(b, ((0, 0), (0, d_pad - b.shape[1]))) for b in biases])

    return dict(w=w_packed, b=b_packed, pack=pack, d_pad=d_pad,
                inp_dim=dims_in[0], out_dim=dims_out[-1],
                num_layers=num_layers)


def mlp_forward(x, params, relu_flags, *, tile_b=2048, matmul_dtype=None,
                act_dtype=None):
    """Fused MLP forward pass.

    x:            (B, inp_dim) activations
    params:       output of prepare_mlp_params() (packed once, reused)
    relu_flags:   per-layer bool (ReLU after that Linear)
    tile_b:       packed rows per grid step (multiple-of-8 when tiled)
    matmul_dtype: e.g. jnp.bfloat16 to feed the MXU in bf16 (f32 accumulate)
    act_dtype:    e.g. jnp.bfloat16 to also store activations bf16 in HBM
    """
    w_packed, b_packed = params["w"], params["b"]
    pack, d_pad = params["pack"], params["d_pad"]
    inp_dim, out_dim = params["inp_dim"], params["out_dim"]
    num_layers = params["num_layers"]
    batch = x.shape[0]
    assert x.shape[1] == inp_dim
    assert len(relu_flags) == num_layers
    out_dtype = act_dtype if act_dtype is not None else x.dtype

    # --- batch tiling over packed rows --------------------------------------
    b_p = pl.cdiv(batch, pack)               # packed rows holding the batch
    if b_p <= tile_b:
        tile = b_p                           # single grid step: block == array
        steps = 1
    else:
        steps = pl.cdiv(b_p, tile_b)
        tile = _round_up(pl.cdiv(b_p, steps), _SUBLANE)
    b_p_pad = tile * steps
    pad_rows = b_p_pad * pack - batch

    if pack > 1:
        if pad_rows:
            x = jnp.pad(x, ((0, pad_rows), (0, 0)))
        x_in = x.reshape(b_p_pad, d_pad)     # free, contiguous reshape
    else:
        # Fallback path: feature zero-pad (only when packing doesn't apply).
        x_in = jnp.pad(x, ((0, pad_rows), (0, d_pad - inp_dim)))
    if act_dtype is not None:
        x_in = x_in.astype(act_dtype)

    kernel = functools.partial(_mlp_kernel, num_layers, tuple(relu_flags),
                               matmul_dtype)

    def _call(single_buffer_params):
        # Weight/bias block index is constant across the grid; single-buffer
        # them to halve their VMEM footprint (matters as D_pad grows on v7x).
        pmode = ({"pipeline_mode": pl.Buffered(1)}
                 if single_buffer_params else {})
        return pl.pallas_call(
            kernel,
            out_shape=jax.ShapeDtypeStruct((b_p_pad, d_pad), out_dtype),
            grid_spec=pltpu.PrefetchScalarGridSpec(
                num_scalar_prefetch=0,
                grid=(steps,),
                in_specs=[
                    # batch tile of packed activations
                    pl.BlockSpec((tile, d_pad), lambda i: (i, 0)),
                    # packed weights: same whole-array block every step
                    pl.BlockSpec((num_layers, d_pad, d_pad),
                                 lambda i: (0, 0, 0), **pmode),
                    # packed biases
                    pl.BlockSpec((num_layers, 1, d_pad),
                                 lambda i: (0, 0, 0), **pmode),
                ],
                out_specs=pl.BlockSpec((tile, d_pad), lambda i: (i, 0)),
            ),
            compiler_params=pltpu.CompilerParams(
                dimension_semantics=("parallel",),   # dual-TC sharding on v7x
            ),
        )(x_in, w_packed, b_packed)

    try:
        out = _call(True)
    except Exception:
        out = _call(False)       # fallback: default double-buffered specs

    if pack > 1:
        out = out.reshape(b_p_pad * pack, out_dim)   # free reshape
        if b_p_pad * pack != batch:
            out = out[:batch]
        return out
    return out[:batch, :out_dim]


def make_mlp_params(key, inp_dim, out_dim, num_layers, layers=()):
    """Deterministic parameter init matching the module's layer shapes.

    Returns (weights, biases) where weights[i] is (in_i, out_i) and biases[i]
    is (1, out_i). (PyTorch stores W as (out, in); we store the transpose so
    the kernel does x @ W.)
    """
    layers = list(layers)
    dims = []
    incoming = inp_dim
    for _ in range(num_layers - 1):
        outgoing = incoming if len(layers) == 0 else layers.pop(0)
        dims.append((incoming, outgoing))
        incoming = outgoing
    dims.append((incoming, out_dim))

    weights, biases = [], []
    for (d_in, d_out) in dims:
        key, wk, bk = jax.random.split(key, 3)
        bound = 1.0 / jnp.sqrt(d_in)  # same scale as PyTorch Linear default
        w = jax.random.uniform(wk, (d_in, d_out), jnp.float32, -bound, bound)
        b = jax.random.uniform(bk, (1, d_out), jnp.float32, -bound, bound)
        weights.append(w)
        biases.append(b)
    return weights, biases


def mlp_reference(x, weights, biases, relu_flags):
    """Pure-JAX reference of the same forward pass."""
    h = x
    for w, b, r in zip(weights, biases, relu_flags):
        h = h @ w + b.reshape(1, -1)
        if r:
            h = jnp.maximum(h, 0.0)
    return h


if __name__ == "__main__":
    # Module config: MLP(inp_dim=32, out_dim=32, num_layers=3, relu=True, bias=True)
    inp_dim, out_dim, num_layers = 32, 32, 3
    batch = 8
    relu = True

    key = jax.random.PRNGKey(0)
    key, xk = jax.random.split(key)
    x = jax.random.normal(xk, (batch, inp_dim), jnp.float32)

    weights, biases = make_mlp_params(key, inp_dim, out_dim, num_layers)
    # ReLU after every hidden Linear; final ReLU because relu=True.
    relu_flags = (True,) * (num_layers - 1) + (relu,)
    # TODO(synk): dropout=False / norm=False in this config; nn.Dropout
    # (train-mode masking) and nn.LayerNorm branches are not implemented here
    # (row-packing would need per-segment masking for LayerNorm statistics).

    params = prepare_mlp_params(weights, biases)   # one-time packing
    y = mlp_forward(x, params, relu_flags)
    y = jax.block_until_ready(y)

    y_ref = mlp_reference(x, weights, biases, relu_flags)
    assert y.shape == (batch, out_dim)
    assert jnp.allclose(y, y_ref, atol=1e-5, rtol=1e-5)

    print("KERNEL_OK")
</pallas_src>

<mosaic_0001>
module attributes {stable_mosaic.version = 11 : i64} {
  func.func @_mlp_kernel(%arg0: i32, %arg1: memref<2x128xf32, #tpu.memory_space<vmem>>, %arg2: memref<3x128x128xf32, #tpu.memory_space<vmem>>, %arg3: memref<3x1x128xf32, #tpu.memory_space<vmem>>, %arg4: memref<2x128xf32, #tpu.memory_space<vmem>>) attributes {dimension_semantics = [#tpu.dimension_semantics<parallel>], iteration_bounds = array<i64: 1>, scalar_prefetch = 0 : i64, scratch_operands = 0 : i64, tpu.core_type = #tpu.core_type<tc>, window_params = [{transform_indices = @transform_0, window_bounds = array<i64: 2, 128>}, {pipeline_mode = #tpu.pipeline_mode<synchronous>, transform_indices = @transform_1, window_bounds = array<i64: 3, 128, 128>}, {pipeline_mode = #tpu.pipeline_mode<synchronous>, transform_indices = @transform_2, window_bounds = array<i64: 3, 1, 128>}, {transform_indices = @transform_3, window_bounds = array<i64: 2, 128>}]} {
    %c0 = arith.constant 0 : index
    %c0_0 = arith.constant 0 : index
    %0 = vector.load %arg1[%c0, %c0_0] : memref<2x128xf32, #tpu.memory_space<vmem>>, vector<2x128xf32>
    %c0_1 = arith.constant 0 : index
    %c0_2 = arith.constant 0 : index
    %c0_3 = arith.constant 0 : index
    %1 = vector.load %arg2[%c0_1, %c0_2, %c0_3] : memref<3x128x128xf32, #tpu.memory_space<vmem>>, vector<1x128x128xf32>
    %2 = vector.shape_cast %1 : vector<1x128x128xf32> to vector<128x128xf32>
    %c0_4 = arith.constant 0 : index
    %c0_5 = arith.constant 0 : index
    %c0_6 = arith.constant 0 : index
    %3 = vector.load %arg3[%c0_4, %c0_5, %c0_6] : memref<3x1x128xf32, #tpu.memory_space<vmem>>, vector<1x1x128xf32>
    %4 = vector.shape_cast %3 : vector<1x1x128xf32> to vector<1x128xf32>
    %cst = arith.constant dense<0.000000e+00> : vector<2x128xf32>
    %5 = tpu.matmul %0, %2, %cst {dimension_numbers = #tpu.dot_dimension_numbers<[1], [0], [0], [1], [0, 0, 1, 1], [], []>} : vector<2x128xf32>, vector<128x128xf32>, vector<2x128xf32> -> vector<2x128xf32>
    %6 = vector.broadcast %4 : vector<1x128xf32> to vector<2x128xf32>
    %7 = arith.addf %5, %6 : vector<2x128xf32>
    %cst_7 = arith.constant 0.000000e+00 : f32
    %8 = vector.broadcast %cst_7 : f32 to vector<2x128xf32>
    %9 = arith.maximumf %7, %8 : vector<2x128xf32>
    %c1 = arith.constant 1 : index
    %c0_8 = arith.constant 0 : index
    %c0_9 = arith.constant 0 : index
    %10 = vector.load %arg2[%c1, %c0_8, %c0_9] : memref<3x128x128xf32, #tpu.memory_space<vmem>>, vector<1x128x128xf32>
    %11 = vector.shape_cast %10 : vector<1x128x128xf32> to vector<128x128xf32>
    %c1_10 = arith.constant 1 : index
    %c0_11 = arith.constant 0 : index
    %c0_12 = arith.constant 0 : index
    %12 = vector.load %arg3[%c1_10, %c0_11, %c0_12] : memref<3x1x128xf32, #tpu.memory_space<vmem>>, vector<1x1x128xf32>
    %13 = vector.shape_cast %12 : vector<1x1x128xf32> to vector<1x128xf32>
    %cst_13 = arith.constant dense<0.000000e+00> : vector<2x128xf32>
    %14 = tpu.matmul %9, %11, %cst_13 {dimension_numbers = #tpu.dot_dimension_numbers<[1], [0], [0], [1], [0, 0, 1, 1], [], []>} : vector<2x128xf32>, vector<128x128xf32>, vector<2x128xf32> -> vector<2x128xf32>
    %15 = vector.broadcast %13 : vector<1x128xf32> to vector<2x128xf32>
    %16 = arith.addf %14, %15 : vector<2x128xf32>
    %cst_14 = arith.constant 0.000000e+00 : f32
    %17 = vector.broadcast %cst_14 : f32 to vector<2x128xf32>
    %18 = arith.maximumf %16, %17 : vector<2x128xf32>
    %c2 = arith.constant 2 : index
    %c0_15 = arith.constant 0 : index
    %c0_16 = arith.constant 0 : index
    %19 = vector.load %arg2[%c2, %c0_15, %c0_16] : memref<3x128x128xf32, #tpu.memory_space<vmem>>, vector<1x128x128xf32>
    %20 = vector.shape_cast %19 : vector<1x128x128xf32> to vector<128x128xf32>
    %c2_17 = arith.constant 2 : index
    %c0_18 = arith.constant 0 : index
    %c0_19 = arith.constant 0 : index
    %21 = vector.load %arg3[%c2_17, %c0_18, %c0_19] : memref<3x1x128xf32, #tpu.memory_space<vmem>>, vector<1x1x128xf32>
    %22 = vector.shape_cast %21 : vector<1x1x128xf32> to vector<1x128xf32>
    %cst_20 = arith.constant dense<0.000000e+00> : vector<2x128xf32>
    %23 = tpu.matmul %18, %20, %cst_20 {dimension_numbers = #tpu.dot_dimension_numbers<[1], [0], [0], [1], [0, 0, 1, 1], [], []>} : vector<2x128xf32>, vector<128x128xf32>, vector<2x128xf32> -> vector<2x128xf32>
    %24 = vector.broadcast %22 : vector<1x128xf32> to vector<2x128xf32>
    %25 = arith.addf %23, %24 : vector<2x128xf32>
    %cst_21 = arith.constant 0.000000e+00 : f32
    %26 = vector.broadcast %cst_21 : f32 to vector<2x128xf32>
    %27 = arith.maximumf %25, %26 : vector<2x128xf32>
    %c0_22 = arith.constant 0 : index
    %c0_23 = arith.constant 0 : index
    %28 = vector.load %arg4[%c0_22, %c0_23] : memref<2x128xf32, #tpu.memory_space<vmem>>, vector<2x128xf32>
    tpu.vector_store %arg4[%c0_22, %c0_23], %27 {strides = array<i32>} : memref<2x128xf32, #tpu.memory_space<vmem>>, vector<2x128xf32>,
    return
  }
  func.func @transform_0(%arg0: i32) -> (i32, i32) {
    %c0_i32 = arith.constant 0 : i32
    %c0_i32_0 = arith.constant 0 : i32
    return %arg0, %c0_i32 : i32, i32
  }
  func.func @transform_1(%arg0: i32) -> (i32, i32, i32) {
    %c0_i32 = arith.constant 0 : i32
    %c0_i32_0 = arith.constant 0 : i32
    %c0_i32_1 = arith.constant 0 : i32
    %c0_i32_2 = arith.constant 0 : i32
    return %c0_i32, %c0_i32_0, %c0_i32_1 : i32, i32, i32
  }
  func.func @transform_2(%arg0: i32) -> (i32, i32, i32) {
    %c0_i32 = arith.constant 0 : i32
    %c0_i32_0 = arith.constant 0 : i32
    %c0_i32_1 = arith.constant 0 : i32
    %c0_i32_2 = arith.constant 0 : i32
    return %c0_i32, %c0_i32_0, %c0_i32_1 : i32, i32, i32
  }
  func.func @transform_3(%arg0: i32) -> (i32, i32) {
    %c0_i32 = arith.constant 0 : i32
    %c0_i32_0 = arith.constant 0 : i32
    return %arg0, %c0_i32 : i32, i32
  }
}

module attributes {stable_mosaic.version = 11 : i64} {
  func.func @_mlp_kernel(%arg0: i32, %arg1: memref<2x128xf32, #tpu.memory_space<vmem>>, %arg2: memref<3x128x128xf32, #tpu.memory_space<vmem>>, %arg3: memref<3x1x128xf32, #tpu.memory_space<vmem>>, %arg4: memref<2x128xf32, #tpu.memory_space<vmem>>) attributes {dimension_semantics = [#tpu.dimension_semantics<parallel>], iteration_bounds = array<i64: 1>, scalar_prefetch = 0 : i64, scratch_operands = 0 : i64, tpu.core_type = #tpu.core_type<tc>, window_params = [{transform_indices = @transform_0, window_bounds = array<i64: 2, 128>}, {pipeline_mode = #tpu.pipeline_mode<synchronous>, transform_indices = @transform_1, window_bounds = array<i64: 3, 128, 128>}, {pipeline_mode = #tpu.pipeline_mode<synchronous>, transform_indices = @transform_2, window_bounds = array<i64: 3, 1, 128>}, {transform_indices = @transform_3, window_bounds = array<i64: 2, 128>}]} {
    %c0 = arith.constant 0 : index
    %c0_0 = arith.constant 0 : index
    %0 = vector.load %arg1[%c0, %c0_0] : memref<2x128xf32, #tpu.memory_space<vmem>>, vector<2x128xf32>
    %c0_1 = arith.constant 0 : index
    %c0_2 = arith.constant 0 : index
    %c0_3 = arith.constant 0 : index
    %1 = vector.load %arg2[%c0_1, %c0_2, %c0_3] : memref<3x128x128xf32, #tpu.memory_space<vmem>>, vector<1x128x128xf32>
    %2 = vector.shape_cast %1 : vector<1x128x128xf32> to vector<128x128xf32>
    %c0_4 = arith.constant 0 : index
    %c0_5 = arith.constant 0 : index
    %c0_6 = arith.constant 0 : index
    %3 = vector.load %arg3[%c0_4, %c0_5, %c0_6] : memref<3x1x128xf32, #tpu.memory_space<vmem>>, vector<1x1x128xf32>
    %4 = vector.shape_cast %3 : vector<1x1x128xf32> to vector<1x128xf32>
    %cst = arith.constant dense<0.000000e+00> : vector<2x128xf32>
    %5 = tpu.matmul %0, %2, %cst {dimension_numbers = #tpu.dot_dimension_numbers<[1], [0], [0], [1], [0, 0, 1, 1], [], []>} : vector<2x128xf32>, vector<128x128xf32>, vector<2x128xf32> -> vector<2x128xf32>
    %6 = vector.broadcast %4 : vector<1x128xf32> to vector<2x128xf32>
    %7 = arith.addf %5, %6 : vector<2x128xf32>
    %cst_7 = arith.constant 0.000000e+00 : f32
    %8 = vector.broadcast %cst_7 : f32 to vector<2x128xf32>
    %9 = arith.maximumf %7, %8 : vector<2x128xf32>
    %c1 = arith.constant 1 : index
    %c0_8 = arith.constant 0 : index
    %c0_9 = arith.constant 0 : index
    %10 = vector.load %arg2[%c1, %c0_8, %c0_9] : memref<3x128x128xf32, #tpu.memory_space<vmem>>, vector<1x128x128xf32>
    %11 = vector.shape_cast %10 : vector<1x128x128xf32> to vector<128x128xf32>
    %c1_10 = arith.constant 1 : index
    %c0_11 = arith.constant 0 : index
    %c0_12 = arith.constant 0 : index
    %12 = vector.load %arg3[%c1_10, %c0_11, %c0_12] : memref<3x1x128xf32, #tpu.memory_space<vmem>>, vector<1x1x128xf32>
    %13 = vector.shape_cast %12 : vector<1x1x128xf32> to vector<1x128xf32>
    %cst_13 = arith.constant dense<0.000000e+00> : vector<2x128xf32>
    %14 = tpu.matmul %9, %11, %cst_13 {dimension_numbers = #tpu.dot_dimension_numbers<[1], [0], [0], [1], [0, 0, 1, 1], [], []>} : vector<2x128xf32>, vector<128x128xf32>, vector<2x128xf32> -> vector<2x128xf32>
    %15 = vector.broadcast %13 : vector<1x128xf32> to vector<2x128xf32>
    %16 = arith.addf %14, %15 : vector<2x128xf32>
    %cst_14 = arith.constant 0.000000e+00 : f32
    %17 = vector.broadcast %cst_14 : f32 to vector<2x128xf32>
    %18 = arith.maximumf %16, %17 : vector<2x128xf32>
    %c2 = arith.constant 2 : index
    %c0_15 = arith.constant 0 : index
    %c0_16 = arith.constant 0 : index
    %19 = vector.load %arg2[%c2, %c0_15, %c0_16] : memref<3x128x128xf32, #tpu.memory_space<vmem>>, vector<1x128x128xf32>
    %20 = vector.shape_cast %19 : vector<1x128x128xf32> to vector<128x128xf32>
    %c2_17 = arith.constant 2 : index
    %c0_18 = arith.constant 0 : index
    %c0_19 = arith.constant 0 : index
    %21 = vector.load %arg3[%c2_17, %c0_18, %c0_19] : memref<3x1x128xf32, #tpu.memory_space<vmem>>, vector<1x1x128xf32>
    %22 = vector.shape_cast %21 : vector<1x1x128xf32> to vector<1x128xf32>
    %cst_20 = arith.constant dense<0.000000e+00> : vector<2x128xf32>
    %23 = tpu.matmul %18, %20, %cst_20 {dimension_numbers = #tpu.dot_dimension_numbers<[1], [0], [0], [1], [0, 0, 1, 1], [], []>} : vector<2x128xf32>, vector<128x128xf32>, vector<2x128xf32> -> vector<2x128xf32>
    %24 = vector.broadcast %22 : vector<1x128xf32> to vector<2x128xf32>
    %25 = arith.addf %23, %24 : vector<2x128xf32>
    %cst_21 = arith.constant 0.000000e+00 : f32
    %26 = vector.broadcast %cst_21 : f32 to vector<2x128xf32>
    %27 = arith.maximumf %25, %26 : vector<2x128xf32>
    %c0_22 = arith.constant 0 : index
    %c0_23 = arith.constant 0 : index
    %28 = vector.load %arg4[%c0_22, %c0_23] : memref<2x128xf32, #tpu.memory_space<vmem>>, vector<2x128xf32>
    tpu.vector_store %arg4[%c0_22, %c0_23], %27 {strides = array<i32>} : memref<2x128xf32, #tpu.memory_space<vmem>>, vector<2x128xf32>,
    return
  }
  func.func @transform_0(%arg0: i32) -> (i32, i32) {
    %c0_i32 = arith.constant 0 : i32
    %c0_i32_0 = arith.constant 0 : i32
    return %arg0, %c0_i32 : i32, i32
  }
  func.func @transform_1(%arg0: i32) -> (i32, i32, i32) {
    %c0_i32 = arith.constant 0 : i32
    %c0_i32_0 = arith.constant 0 : i32
    %c0_i32_1 = arith.constant 0 : i32
    %c0_i32_2 = arith.constant 0 : i32
    return %c0_i32, %c0_i32_0, %c0_i32_1 : i32, i32, i32
  }
  func.func @transform_2(%arg0: i32) -> (i32, i32, i32) {
    %c0_i32 = arith.constant 0 : i32
    %c0_i32_0 = arith.constant 0 : i32
    %c0_i32_1 = arith.constant 0 : i32
    %c0_i32_2 = arith.constant 0 : i32
    return %c0_i32, %c0_i32_0, %c0_i32_1 : i32, i32, i32
  }
  func.func @transform_3(%arg0: i32) -> (i32, i32) {
    %c0_i32 = arith.constant 0 : i32
    %c0_i32_0 = arith.constant 0 : i32
    return %arg0, %c0_i32 : i32, i32
  }
}

</mosaic_0001>

<bundles_post_ra>
// kernel: tpu_custom_call.1
= control target key start
LH: loop header
LB: loop body
LE: loop exit
PB: predicated region body
PF: predicated region fallthrough
CT: control target
= control target key end

     0   :  { %8 = vsyncpa [#allocation3], 0  ;;  %s360_s0 = inlined_call_operand.hbm [shape: f32[2,128], index: 0, kind: input, shape index: {}]   ;;  %s361_s1 = inlined_call_operand.hbm [shape: f32[3,128,128], index: 1, kind: input, shape index: {}]   ;;  %s362_s2 = inlined_call_operand.hbm [shape: f32[3,1,128], index: 2, kind: input, shape index: {}]   ;;  %s363_s3 = inlined_call_operand.hbm [shape: f32[2,128], index: 3, kind: output, shape index: {}]  }
   0x1   :  { %9 = vsyncpa [#allocation6], 0  ;;  %s26_s14 = sshll.u32 %s361_s1, 4  ;;  %s27_s14 = int_to_ptr.hbm [resolvable:$true] %s26_s14 }
   0x2   :  { %10 = vsyncpa [#allocation4], 0  ;;  %s320_s15 = smov [#allocation5]   ;;  %s16_s19 = sshll.u32 %s360_s0, 4  ;;  %s17_s19 = int_to_ptr.hbm [resolvable:$true] %s16_s19 }
   0x3   :  { %s28_s16 = sshll.u32 %s320_s15, 4  ;;  %s321_s20 = smov 128   ;;  %s29_s16 = int_to_ptr.vmem [resolvable:$true] %s28_s16 }
   0x4   :  { %s322_s21 = smov 8   ;;  %s323_s22 = smov [#allocation2]  }
   0x5   :  { %34 = dma.hbm_to_vmem [thread:$0]  %s27_s14, 6144, %s29_s16, [#allocation6], %s321_s20, %s321_s20, %s322_s21  }
   0x6   :  { %s18_s23 = sshll.u32 %s323_s22, 4  ;;  %s39_s26 = sshll.u32 %s362_s2, 4  ;;  %s19_s23 = int_to_ptr.vmem [resolvable:$true] %s18_s23  ;;  %s40_s26 = int_to_ptr.hbm [resolvable:$true] %s39_s26 }
   0x7   :  { %21 = dma.hbm_to_vmem [thread:$0]  %s17_s19, 32, %s19_s23, [#allocation3]  }
   0x8   :  { %s324_s1 = smov [#allocation7]   ;;  %s325_s28 = smov 16  }
   0x9   :  { %s41_s27 = sshll.u32 %s324_s1, 4  ;;  %s326_s29 = smov 1   ;;  %s42_s27 = int_to_ptr.vmem [resolvable:$true] %s41_s27 }
   0xa   :  { %47 = dma.hbm_to_vmem [thread:$0]  %s40_s26, 48, %s42_s27, [#allocation6], %s325_s28, %s325_s28, %s326_s29  }
   0xb   :  { %314 = dma.done.wait [#allocation3], 32  }
   0xc   :  { %315 = vsyncadd [#allocation3], 4294967264 }
   0xd   :  { %316 = dma.done.wait [#allocation6], 6192  }
   0xe   :  { %317 = vsyncadd [#allocation6], 4294961104  ;;  %v76_v0 = vld [vmem:[#allocation5 + $0x78] sm:$0xff]  ;;  %v75_v1 = vld [vmem:[#allocation5 + $0x70] sm:$0xff]  ;;  %s327_s0 = smov [#allocation8]   ;;  %s196_s5 = sshll.u32 %s363_s3, 4  ;;  %s197_s5 = int_to_ptr.hbm [resolvable:$true] %s196_s5 }
   0xf   :  { %81 = vmatpush.msra.mxu0 %v76_v0  ;;  %v74_v2 = vld [vmem:[#allocation5 + $0x68] sm:$0xff]  ;;  %v73_v3 = vld [vmem:[#allocation5 + $0x60] sm:$0xff]  ;;  %v118_v4 = vld [vmem:[#allocation5 + $0xf8] sm:$0xff]  ;;  %s194_s2 = sshll.u32 %s327_s0, 4  ;;  %s195_s2 = int_to_ptr.vmem [resolvable:$true] %s194_s2 }
  0x10   :  { %v72_v5 = vld [vmem:[#allocation5 + $0x58] sm:$0xff]  ;;  %124 = vmatpush.msra.mxu1 %v118_v4  ;;  %v117_v6 = vld [vmem:[#allocation5 + $0xf0] sm:$0xff]  ;;  %v116_v7 = vld [vmem:[#allocation5 + $0xe8] sm:$0xff] }
  0x11   :  { %82 = vmatpush.msra.mxu0 %v75_v1  ;;  %v71_v8 = vld [vmem:[#allocation5 + $0x50] sm:$0xff]  ;;  %v115_v9 = vld [vmem:[#allocation5 + $0xe0] sm:$0xff]  ;;  %v70_v10 = vld [vmem:[#allocation5 + $0x48] sm:$0xff] }
  0x12   :  { %125 = vmatpush.msra.mxu1 %v117_v6  ;;  %v114_v11 = vld [vmem:[#allocation5 + $0xd8] sm:$0xff]  ;;  %v69_v12 = vld [vmem:[#allocation5 + $0x40] sm:$0xff]  ;;  %v113_v13 = vld [vmem:[#allocation5 + $0xd0] sm:$0xff] }
  0x13   :  { %83 = vmatpush.msra.mxu0 %v74_v2  ;;  %v68_v14 = vld [vmem:[#allocation5 + $0x38] sm:$0xff]  ;;  %v112_v15 = vld [vmem:[#allocation5 + $0xc8] sm:$0xff]  ;;  %v67_v16 = vld [vmem:[#allocation5 + $0x30] sm:$0xff] }
  0x14   :  { %126 = vmatpush.msra.mxu1 %v116_v7  ;;  %v111_v17 = vld [vmem:[#allocation5 + $0xc0] sm:$0xff]  ;;  %v66_v18 = vld [vmem:[#allocation5 + $0x28] sm:$0xff]  ;;  %v110_v19 = vld [vmem:[#allocation5 + $0xb8] sm:$0xff] }
  0x15   :  { %84 = vmatpush.msra.mxu0 %v73_v3  ;;  %v65_v20 = vld [vmem:[#allocation5 + $0x20] sm:$0xff]  ;;  %v109_v21 = vld [vmem:[#allocation5 + $0xb0] sm:$0xff]  ;;  %v64_v22 = vld [vmem:[#allocation5 + $0x18] sm:$0xff] }
  0x16   :  { %127 = vmatpush.msra.mxu1 %v115_v9  ;;  %v108_v23 = vld [vmem:[#allocation5 + $0xa8] sm:$0xff]  ;;  %v63_v24 = vld [vmem:[#allocation5 + $0x10] sm:$0xff]  ;;  %v107_v25 = vld [vmem:[#allocation5 + $0xa0] sm:$0xff] }
  0x17   :  { %85 = vmatpush.msra.mxu0 %v72_v5  ;;  %v62_v26 = vld [vmem:[#allocation5 + $0x8] sm:$0xff]  ;;  %v106_v27 = vld [vmem:[#allocation5 + $0x98] sm:$0xff]  ;;  %v61_v28 = vld [vmem:[#allocation5] sm:$0xff] }
  0x18   :  { %128 = vmatpush.msra.mxu1 %v114_v11  ;;  %v60_v29 = vld [vmem:[#allocation2] sm:$0x3]  ;;  %v105_v30 = vld [vmem:[#allocation5 + $0x90] sm:$0xff]  ;;  %v104_v31 = vld [vmem:[#allocation5 + $0x88] sm:$0xff] }
  0x19   :  { %86 = vmatpush.msra.mxu0 %v71_v8  ;;  %v103_v32 = vld [vmem:[#allocation5 + $0x80] sm:$0xff]  ;;  %v161_v33 = vld [vmem:[#allocation5 + $0x178] sm:$0xff]  ;;  %v160_v34 = vld [vmem:[#allocation5 + $0x170] sm:$0xff] }
  0x1a   :  { %129 = vmatpush.msra.mxu1 %v113_v13  ;;  %167 = vmatpush.msra.mxu2 %v161_v33  ;;  %v159_v35 = vld [vmem:[#allocation5 + $0x168] sm:$0xff]  ;;  %v158_v36 = vld [vmem:[#allocation5 + $0x160] sm:$0xff]  ;;  %v157_v37 = vld [vmem:[#allocation5 + $0x158] sm:$0xff] }
  0x1b   :  { %87 = vmatpush.msra.mxu0 %v70_v10  ;;  %v156_v38 = vld [vmem:[#allocation5 + $0x150] sm:$0xff]  ;;  %v155_v39 = vld [vmem:[#allocation5 + $0x148] sm:$0xff]  ;;  %v154_v40 = vld [vmem:[#allocation5 + $0x140] sm:$0xff] }
  0x1c   :  { %130 = vmatpush.msra.mxu1 %v112_v15  ;;  %168 = vmatpush.msra.mxu2 %v160_v34  ;;  %v153_v41 = vld [vmem:[#allocation5 + $0x138] sm:$0xff]  ;;  %v152_v42 = vld [vmem:[#allocation5 + $0x130] sm:$0xff]  ;;  %v151_v43 = vld [vmem:[#allocation5 + $0x128] sm:$0xff] }
  0x1d   :  { %88 = vmatpush.msra.mxu0 %v69_v12  ;;  %v150_v44 = vld [vmem:[#allocation5 + $0x120] sm:$0xff]  ;;  %v149_v45 = vld [vmem:[#allocation5 + $0x118] sm:$0xff]  ;;  %v148_v50 = vld [vmem:[#allocation5 + $0x110] sm:$0xff] }
  0x1e   :  { %131 = vmatpush.msra.mxu1 %v111_v17  ;;  %169 = vmatpush.msra.mxu2 %v159_v35  ;;  %v215_v46 = vld [vmem:[#allocation7] ss:$0 sm:$0xff]  ;;  %v147_v51 = vld [vmem:[#allocation5 + $0x108] sm:$0xff]  ;;  %v216_v53 = vld [vmem:[#allocation7 + $0x1] ss:$0 sm:$0xff] }
  0x1f   :  { %89 = vmatpush.msra.mxu0 %v68_v14  ;;  %v146_v52 = vld [vmem:[#allocation5 + $0x100] sm:$0xff] }
  0x20   :  { %132 = vmatpush.msra.mxu1 %v110_v19  ;;  %170 = vmatpush.msra.mxu2 %v158_v36  ;;  %v217_v57 = vld [vmem:[#allocation7 + $0x2] ss:$0 sm:$0xff] }
  0x21   :  { %90 = vmatpush.msra.mxu0 %v67_v16 }
  0x22   :  { %133 = vmatpush.msra.mxu1 %v109_v21  ;;  %171 = vmatpush.msra.mxu2 %v157_v37 }
  0x23   :  { %91 = vmatpush.msra.mxu0 %v66_v18 }
  0x24   :  { %134 = vmatpush.msra.mxu1 %v108_v23  ;;  %172 = vmatpush.msra.mxu2 %v156_v38 }
  0x25   :  { %92 = vmatpush.msra.mxu0 %v65_v20 }
  0x26   :  { %135 = vmatpush.msra.mxu1 %v107_v25  ;;  %173 = vmatpush.msra.mxu2 %v155_v39 }
  0x27   :  { %93 = vmatpush.msra.mxu0 %v64_v22 }
  0x28   :  { %136 = vmatpush.msra.mxu1 %v106_v27  ;;  %174 = vmatpush.msra.mxu2 %v154_v40 }
  0x29   :  { %94 = vmatpush.msra.mxu0 %v63_v24 }
  0x2a   :  { %137 = vmatpush.msra.mxu1 %v105_v30  ;;  %175 = vmatpush.msra.mxu2 %v153_v41 }
  0x2b   :  { %95 = vmatpush.msra.mxu0 %v62_v26 }
  0x2c   :  { %138 = vmatpush.msra.mxu1 %v104_v31  ;;  %176 = vmatpush.msra.mxu2 %v152_v42 }
  0x2d   :  { %96 = vmatpush.msra.mxu0 %v61_v28 }
  0x2e   :  { %97 = vmatmul.f32.vlgmr.msra.gmra.mxu0 %v60_v29  ;;  %139 = vmatpush.msra.mxu1 %v103_v32 }
  0x2f   :  { %177 = vmatpush.msra.mxu2 %v151_v43 }
  0x31   :  { %178 = vmatpush.msra.mxu2 %v150_v44 }
  0x33   :  { %179 = vmatpush.msra.mxu2 %v149_v45 }
  0x35   :  { %180 = vmatpush.msra.mxu2 %v148_v50 }
  0x37   :  { %181 = vmatpush.msra.mxu2 %v147_v51 }
  0x39   :  { %182 = vmatpush.msra.mxu2 %v146_v52 }
  0xab   :  { %v98_v47 = vpop.f32.mrf.mxu0 }
  0xac   :  { %v99_v48 = vadd.f32 %v215_v46, %v98_v47 }
  0xae   :  { %v101_v49 = vmax.f32 %v99_v48, 0.0 }
  0xb0   :  { %140 = vmatmul.f32.vlgmr.msra.gmra.mxu1 %v101_v49 }
 0x12d   :  { %v141_v54 = vpop.f32.mrf.mxu1 }
 0x12e   :  { %v142_v55 = vadd.f32 %v216_v53, %v141_v54 }
 0x130   :  { %v144_v56 = vmax.f32 %v142_v55, 0.0 }
 0x132   :  { %183 = vmatmul.f32.vlgmr.msra.gmra.mxu2 %v144_v56 }
 0x1b5   :  { %v184_v58 = vpop.f32.mrf.mxu2 }
 0x1b6   :  { %v185_v59 = vadd.f32 %v217_v57, %v184_v58 }
 0x1b8   :  { %v187_v60 = vmax.f32 %v185_v59, 0.0 }
 0x1ba   :  { %188 = vst [vmem:[#allocation8] sm:$0x3] %v187_v60 }
 0x1bb   :  { %199 = dma.vmem_to_hbm [thread:$0]  %s195_s2, 32, %s197_s5, [#allocation4]  }
 0x1bc   :  { %318 = dma.done.wait [#allocation4], 32  }
 0x1bd   :  { %319 = vsyncadd [#allocation4], 4294967264 }
 0x1be   :  { %204 = vsyncpa [#allocation3], 1 }
 0x1bf   :  { %205 = vsyncpa [#allocation6], 1 }
 0x1c0   :  { %206 = vsyncpa [#allocation4], 1 }

// kernel: tpu_custom_call.1
= control target key start
LH: loop header
LB: loop body
LE: loop exit
PB: predicated region body
PF: predicated region fallthrough
CT: control target
= control target key end

     0   :  { %8 = vsyncpa [#allocation3], 0  ;;  %s360_s0 = inlined_call_operand.hbm [shape: f32[2,128], index: 0, kind: input, shape index: {}]   ;;  %s361_s1 = inlined_call_operand.hbm [shape: f32[3,128,128], index: 1, kind: input, shape index: {}]   ;;  %s362_s2 = inlined_call_operand.hbm [shape: f32[3,1,128], index: 2, kind: input, shape index: {}]   ;;  %s363_s3 = inlined_call_operand.hbm [shape: f32[2,128], index: 3, kind: output, shape index: {}]  }
   0x1   :  { %9 = vsyncpa [#allocation6], 0  ;;  %s26_s14 = sshll.u32 %s361_s1, 4  ;;  %s27_s14 = int_to_ptr.hbm [resolvable:$true] %s26_s14 }
   0x2   :  { %10 = vsyncpa [#allocation4], 0  ;;  %s320_s15 = smov [#allocation5]   ;;  %s16_s19 = sshll.u32 %s360_s0, 4  ;;  %s17_s19 = int_to_ptr.hbm [resolvable:$true] %s16_s19 }
   0x3   :  { %s28_s16 = sshll.u32 %s320_s15, 4  ;;  %s321_s20 = smov 128   ;;  %s29_s16 = int_to_ptr.vmem [resolvable:$true] %s28_s16 }
   0x4   :  { %s322_s21 = smov 8   ;;  %s323_s22 = smov [#allocation2]  }
   0x5   :  { %34 = dma.hbm_to_vmem [thread:$0]  %s27_s14, 6144, %s29_s16, [#allocation6], %s321_s20, %s321_s20, %s322_s21  }
   0x6   :  { %s18_s23 = sshll.u32 %s323_s22, 4  ;;  %s39_s26 = sshll.u32 %s362_s2, 4  ;;  %s19_s23 = int_to_ptr.vmem [resolvable:$true] %s18_s23  ;;  %s40_s26 = int_to_ptr.hbm [resolvable:$true] %s39_s26 }
   0x7   :  { %21 = dma.hbm_to_vmem [thread:$0]  %s17_s19, 32, %s19_s23, [#allocation3]  }
   0x8   :  { %s324_s1 = smov [#allocation7]   ;;  %s325_s28 = smov 16  }
   0x9   :  { %s41_s27 = sshll.u32 %s324_s1, 4  ;;  %s326_s29 = smov 1   ;;  %s42_s27 = int_to_ptr.vmem [resolvable:$true] %s41_s27 }
   0xa   :  { %47 = dma.hbm_to_vmem [thread:$0]  %s40_s26, 48, %s42_s27, [#allocation6], %s325_s28, %s325_s28, %s326_s29  }
   0xb   :  { %314 = dma.done.wait [#allocation3], 32  }
   0xc   :  { %315 = vsyncadd [#allocation3], 4294967264 }
   0xd   :  { %316 = dma.done.wait [#allocation6], 6192  }
   0xe   :  { %317 = vsyncadd [#allocation6], 4294961104  ;;  %v76_v0 = vld [vmem:[#allocation5 + $0x78] sm:$0xff]  ;;  %v75_v1 = vld [vmem:[#allocation5 + $0x70] sm:$0xff]  ;;  %s327_s0 = smov [#allocation8]   ;;  %s196_s5 = sshll.u32 %s363_s3, 4  ;;  %s197_s5 = int_to_ptr.hbm [resolvable:$true] %s196_s5 }
   0xf   :  { %81 = vmatpush.msra.mxu0 %v76_v0  ;;  %v74_v2 = vld [vmem:[#allocation5 + $0x68] sm:$0xff]  ;;  %v73_v3 = vld [vmem:[#allocation5 + $0x60] sm:$0xff]  ;;  %v118_v4 = vld [vmem:[#allocation5 + $0xf8] sm:$0xff]  ;;  %s194_s2 = sshll.u32 %s327_s0, 4  ;;  %s195_s2 = int_to_ptr.vmem [resolvable:$true] %s194_s2 }
  0x10   :  { %v72_v5 = vld [vmem:[#allocation5 + $0x58] sm:$0xff]  ;;  %124 = vmatpush.msra.mxu1 %v118_v4  ;;  %v117_v6 = vld [vmem:[#allocation5 + $0xf0] sm:$0xff]  ;;  %v116_v7 = vld [vmem:[#allocation5 + $0xe8] sm:$0xff] }
  0x11   :  { %82 = vmatpush.msra.mxu0 %v75_v1  ;;  %v71_v8 = vld [vmem:[#allocation5 + $0x50] sm:$0xff]  ;;  %v115_v9 = vld [vmem:[#allocation5 + $0xe0] sm:$0xff]  ;;  %v70_v10 = vld [vmem:[#allocation5 + $0x48] sm:$0xff] }
  0x12   :  { %125 = vmatpush.msra.mxu1 %v117_v6  ;;  %v114_v11 = vld [vmem:[#allocation5 + $0xd8] sm:$0xff]  ;;  %v69_v12 = vld [vmem:[#allocation5 + $0x40] sm:$0xff]  ;;  %v113_v13 = vld [vmem:[#allocation5 + $0xd0] sm:$0xff] }
  0x13   :  { %83 = vmatpush.msra.mxu0 %v74_v2  ;;  %v68_v14 = vld [vmem:[#allocation5 + $0x38] sm:$0xff]  ;;  %v112_v15 = vld [vmem:[#allocation5 + $0xc8] sm:$0xff]  ;;  %v67_v16 = vld [vmem:[#allocation5 + $0x30] sm:$0xff] }
  0x14   :  { %126 = vmatpush.msra.mxu1 %v116_v7  ;;  %v111_v17 = vld [vmem:[#allocation5 + $0xc0] sm:$0xff]  ;;  %v66_v18 = vld [vmem:[#allocation5 + $0x28] sm:$0xff]  ;;  %v110_v19 = vld [vmem:[#allocation5 + $0xb8] sm:$0xff] }
  0x15   :  { %84 = vmatpush.msra.mxu0 %v73_v3  ;;  %v65_v20 = vld [vmem:[#allocation5 + $0x20] sm:$0xff]  ;;  %v109_v21 = vld [vmem:[#allocation5 + $0xb0] sm:$0xff]  ;;  %v64_v22 = vld [vmem:[#allocation5 + $0x18] sm:$0xff] }
  0x16   :  { %127 = vmatpush.msra.mxu1 %v115_v9  ;;  %v108_v23 = vld [vmem:[#allocation5 + $0xa8] sm:$0xff]  ;;  %v63_v24 = vld [vmem:[#allocation5 + $0x10] sm:$0xff]  ;;  %v107_v25 = vld [vmem:[#allocation5 + $0xa0] sm:$0xff] }
  0x17   :  { %85 = vmatpush.msra.mxu0 %v72_v5  ;;  %v62_v26 = vld [vmem:[#allocation5 + $0x8] sm:$0xff]  ;;  %v106_v27 = vld [vmem:[#allocation5 + $0x98] sm:$0xff]  ;;  %v61_v28 = vld [vmem:[#allocation5] sm:$0xff] }
  0x18   :  { %128 = vmatpush.msra.mxu1 %v114_v11  ;;  %v60_v29 = vld [vmem:[#allocation2] sm:$0x3]  ;;  %v105_v30 = vld [vmem:[#allocation5 + $0x90] sm:$0xff]  ;;  %v104_v31 = vld [vmem:[#allocation5 + $0x88] sm:$0xff] }
  0x19   :  { %86 = vmatpush.msra.mxu0 %v71_v8  ;;  %v103_v32 = vld [vmem:[#allocation5 + $0x80] sm:$0xff]  ;;  %v161_v33 = vld [vmem:[#allocation5 + $0x178] sm:$0xff]  ;;  %v160_v34 = vld [vmem:[#allocation5 + $0x170] sm:$0xff] }
  0x1a   :  { %129 = vmatpush.msra.mxu1 %v113_v13  ;;  %167 = vmatpush.msra.mxu2 %v161_v33  ;;  %v159_v35 = vld [vmem:[#allocation5 + $0x168] sm:$0xff]  ;;  %v158_v36 = vld [vmem:[#allocation5 + $0x160] sm:$0xff]  ;;  %v157_v37 = vld [vmem:[#allocation5 + $0x158] sm:$0xff] }
  0x1b   :  { %87 = vmatpush.msra.mxu0 %v70_v10  ;;  %v156_v38 = vld [vmem:[#allocation5 + $0x150] sm:$0xff]  ;;  %v155_v39 = vld [vmem:[#allocation5 + $0x148] sm:$0xff]  ;;  %v154_v40 = vld [vmem:[#allocation5 + $0x140] sm:$0xff] }
  0x1c   :  { %130 = vmatpush.msra.mxu1 %v112_v15  ;;  %168 = vmatpush.msra.mxu2 %v160_v34  ;;  %v153_v41 = vld [vmem:[#allocation5 + $0x138] sm:$0xff]  ;;  %v152_v42 = vld [vmem:[#allocation5 + $0x130] sm:$0xff]  ;;  %v151_v43 = vld [vmem:[#allocation5 + $0x128] sm:$0xff] }
  0x1d   :  { %88 = vmatpush.msra.mxu0 %v69_v12  ;;  %v150_v44 = vld [vmem:[#allocation5 + $0x120] sm:$0xff]  ;;  %v149_v45 = vld [vmem:[#allocation5 + $0x118] sm:$0xff]  ;;  %v148_v50 = vld [vmem:[#allocation5 + $0x110] sm:$0xff] }
  0x1e   :  { %131 = vmatpush.msra.mxu1 %v111_v17  ;;  %169 = vmatpush.msra.mxu2 %v159_v35  ;;  %v215_v46 = vld [vmem:[#allocation7] ss:$0 sm:$0xff]  ;;  %v147_v51 = vld [vmem:[#allocation5 + $0x108] sm:$0xff]  ;;  %v216_v53 = vld [vmem:[#allocation7 + $0x1] ss:$0 sm:$0xff] }
  0x1f   :  { %89 = vmatpush.msra.mxu0 %v68_v14  ;;  %v146_v52 = vld [vmem:[#allocation5 + $0x100] sm:$0xff] }
  0x20   :  { %132 = vmatpush.msra.mxu1 %v110_v19  ;;  %170 = vmatpush.msra.mxu2 %v158_v36  ;;  %v217_v57 = vld [vmem:[#allocation7 + $0x2] ss:$0 sm:$0xff] }
  0x21   :  { %90 = vmatpush.msra.mxu0 %v67_v16 }
  0x22   :  { %133 = vmatpush.msra.mxu1 %v109_v21  ;;  %171 = vmatpush.msra.mxu2 %v157_v37 }
  0x23   :  { %91 = vmatpush.msra.mxu0 %v66_v18 }
  0x24   :  { %134 = vmatpush.msra.mxu1 %v108_v23  ;;  %172 = vmatpush.msra.mxu2 %v156_v38 }
  0x25   :  { %92 = vmatpush.msra.mxu0 %v65_v20 }
  0x26   :  { %135 = vmatpush.msra.mxu1 %v107_v25  ;;  %173 = vmatpush.msra.mxu2 %v155_v39 }
  0x27   :  { %93 = vmatpush.msra.mxu0 %v64_v22 }
  0x28   :  { %136 = vmatpush.msra.mxu1 %v106_v27  ;;  %174 = vmatpush.msra.mxu2 %v154_v40 }
  0x29   :  { %94 = vmatpush.msra.mxu0 %v63_v24 }
  0x2a   :  { %137 = vmatpush.msra.mxu1 %v105_v30  ;;  %175 = vmatpush.msra.mxu2 %v153_v41 }
  0x2b   :  { %95 = vmatpush.msra.mxu0 %v62_v26 }
  0x2c   :  { %138 = vmatpush.msra.mxu1 %v104_v31  ;;  %176 = vmatpush.msra.mxu2 %v152_v42 }
  0x2d   :  { %96 = vmatpush.msra.mxu0 %v61_v28 }
  0x2e   :  { %97 = vmatmul.f32.vlgmr.msra.gmra.mxu0 %v60_v29  ;;  %139 = vmatpush.msra.mxu1 %v103_v32 }
  0x2f   :  { %177 = vmatpush.msra.mxu2 %v151_v43 }
  0x31   :  { %178 = vmatpush.msra.mxu2 %v150_v44 }
  0x33   :  { %179 = vmatpush.msra.mxu2 %v149_v45 }
  0x35   :  { %180 = vmatpush.msra.mxu2 %v148_v50 }
  0x37   :  { %181 = vmatpush.msra.mxu2 %v147_v51 }
  0x39   :  { %182 = vmatpush.msra.mxu2 %v146_v52 }
  0xab   :  { %v98_v47 = vpop.f32.mrf.mxu0 }
  0xac   :  { %v99_v48 = vadd.f32 %v215_v46, %v98_v47 }
  0xae   :  { %v101_v49 = vmax.f32 %v99_v48, 0.0 }
  0xb0   :  { %140 = vmatmul.f32.vlgmr.msra.gmra.mxu1 %v101_v49 }
 0x12d   :  { %v141_v54 = vpop.f32.mrf.mxu1 }
 0x12e   :  { %v142_v55 = vadd.f32 %v216_v53, %v141_v54 }
 0x130   :  { %v144_v56 = vmax.f32 %v142_v55, 0.0 }
 0x132   :  { %183 = vmatmul.f32.vlgmr.msra.gmra.mxu2 %v144_v56 }
 0x1b5   :  { %v184_v58 = vpop.f32.mrf.mxu2 }
 0x1b6   :  { %v185_v59 = vadd.f32 %v217_v57, %v184_v58 }
 0x1b8   :  { %v187_v60 = vmax.f32 %v185_v59, 0.0 }
 0x1ba   :  { %188 = vst [vmem:[#allocation8] sm:$0x3] %v187_v60 }
 0x1bb   :  { %199 = dma.vmem_to_hbm [thread:$0]  %s195_s2, 32, %s197_s5, [#allocation4]  }
 0x1bc   :  { %318 = dma.done.wait [#allocation4], 32  }
 0x1bd   :  { %319 = vsyncadd [#allocation4], 4294967264 }
 0x1be   :  { %204 = vsyncpa [#allocation3], 1 }
 0x1bf   :  { %205 = vsyncpa [#allocation6], 1 }
 0x1c0   :  { %206 = vsyncpa [#allocation4], 1 }

</bundles_post_ra>
